<compile_context>
chip_gen: v7x
topology: tpu7x:2x2x1
jax: 0.10.0
libtpu: 0.0.40
codegen_flags: <defaults>
</compile_context>

<pallas_src>
import numpy as np

import jax
import jax.numpy as jnp
from jax.experimental import pallas as pl
from jax.experimental.pallas import tpu as pltpu


def _copy_kernel(x_ref, o_ref):
    # Pure identity copy of one lane-dense tile.
    o_ref[...] = x_ref[...]


def _sublane_pack(dtype):
    """Sublane packing factor: 8 for 32-bit, 16 for bf16, 32 for int8/fp8."""
    itemsize = jnp.dtype(dtype).itemsize
    return 8 * max(1, 4 // itemsize)


def _largest_lane_width(total, lane_cap):
    """Largest multiple of 128 that divides `total` and is <= lane_cap.

    Returns None if `total` is not a multiple of 128.
    """
    if total % 128 != 0:
        return None
    q = total // 128
    limit = max(1, lane_cap // 128)
    best = 0
    d = 1
    while d * d <= q:
        if q % d == 0:
            for cand in (d, q // d):
                if cand <= limit and cand > best:
                    best = cand
        d += 1
    return best * 128 if best else None


def _pick_block(dim, target, align):
    """Legal block size along one axis.

    Full extent if it fits (always legal); otherwise a multiple of `align`,
    preferring a divisor of `dim` near `target` so there is no ragged,
    masked last block.
    """
    if dim <= target or dim <= align:
        return dim
    target = max(align, (target // align) * align)
    d = target
    while d >= align:
        if dim % d == 0:
            return d
        d -= align
    return target


def flatten(x, *, use_pallas_copy=True, tile_bytes=4 << 20, lane_cap=8192):
    """Pallas equivalent of `x.view(x.size(0), -1)`.

    use_pallas_copy=False returns the free metadata reshape (recommended for
    standalone use); True routes through the identity-copy kernel (for use
    inside a fused Pallas pipeline).
    """
    n = int(x.shape[0])
    flat = 1
    for s in x.shape[1:]:
        flat *= int(s)

    if not use_pallas_copy:
        return jnp.reshape(x, (n, flat))

    dtype = x.dtype
    itemsize = jnp.dtype(dtype).itemsize
    pack = _sublane_pack(dtype)
    total = n * flat
    tile_elems = max(pack * 128, tile_bytes // itemsize)

    bf = _largest_lane_width(total, min(lane_cap, tile_elems))
    if bf is not None:
        # Layout-equivalent, lane-dense slab: (rows, bf), bf % 128 == 0,
        # blocks cover the full lane width -> unmasked full-lane stores.
        rows = total // bf
        bn = _pick_block(rows, max(pack, tile_elems // bf), pack)
        x_view = jnp.reshape(x, (rows, bf))
        grid = (pl.cdiv(rows, bn),)
        in_spec = pl.BlockSpec((bn, bf), lambda i: (i, 0))
        out_spec = pl.BlockSpec((bn, bf), lambda i: (i, 0))
        out_shape_2d = (rows, bf)
        dims = ("parallel",)
    else:
        # Fallback: tile the logical (n, flat) view with legal, aligned blocks.
        x_view = jnp.reshape(x, (n, flat))
        bn = _pick_block(n, max(pack, 256), pack)
        bf = _pick_block(flat, max(128, tile_elems // max(bn, 1)), 128)
        grid = (pl.cdiv(n, bn), pl.cdiv(flat, bf))
        in_spec = pl.BlockSpec((bn, bf), lambda i, j: (i, j))
        out_spec = pl.BlockSpec((bn, bf), lambda i, j: (i, j))
        out_shape_2d = (n, flat)
        dims = ("parallel", "parallel")

    # Live VMEM ~= 2 arrays x 2 buffers x tile; clamp to 48 MiB (safe on v7x's
    # 64 MiB physical VMEM, overrides v5e's 16 MiB scoped default).
    tile_b = bn * bf * itemsize
    vmem_limit = int(min(48 << 20, max(32 << 20, 6 * tile_b)))

    cost = pl.CostEstimate(
        flops=0,
        transcendentals=0,
        bytes_accessed=2 * total * itemsize,  # read + write
    )

    out2d = pl.pallas_call(
        _copy_kernel,
        out_shape=jax.ShapeDtypeStruct(out_shape_2d, dtype),
        grid=grid,
        in_specs=[in_spec],
        out_specs=out_spec,
        compiler_params=pltpu.CompilerParams(
            dimension_semantics=dims,
            vmem_limit_bytes=vmem_limit,
        ),
        cost_estimate=cost,
    )(x_view)

    return jnp.reshape(out2d, (n, flat))


if __name__ == "__main__":
    key = jax.random.PRNGKey(0)
    k1, k2, k3, k4, k5 = jax.random.split(key, 5)

    def check(x, **kw):
        out = jax.block_until_ready(flatten(x, **kw))
        ref = jnp.reshape(x, (x.shape[0], -1))
        assert out.shape == ref.shape, (out.shape, ref.shape)
        assert out.dtype == x.dtype, (out.dtype, x.dtype)
        np.testing.assert_array_equal(np.asarray(out), np.asarray(ref))

    # 1) Canonical NCHW feature map: batch=2, C=4, 16x16 -> slab path, 1 tile.
    check(jax.random.normal(k1, (2, 4, 16, 16), dtype=jnp.float32))

    # 2) Ragged logical flat dim (1200) but total is a multiple of 128 ->
    #    slab path picks a lane-dense width (no masked stores).
    check(jax.random.normal(k2, (16, 3, 20, 20), dtype=jnp.float32))

    # 3) Total not a multiple of 128 -> logical-shape fallback path.
    check(jax.random.normal(k3, (4, 3, 5, 7), dtype=jnp.float32))

    # 4) Force a real multi-block grid along the slab rows axis.
    check(jax.random.normal(k4, (8, 16, 32, 32), dtype=jnp.float32),
          tile_bytes=128 << 10)

    # 5) bf16 (sublane pack 16) through the same path.
    check(jax.random.normal(k5, (2, 4, 16, 16),
                            dtype=jnp.float32).astype(jnp.bfloat16))

    # 6) Standalone fast path: pure metadata reshape, no kernel launched.
    xf = jax.random.normal(k1, (2, 4, 16, 16), dtype=jnp.float32)
    np.testing.assert_array_equal(
        np.asarray(flatten(xf, use_pallas_copy=False)),
        np.asarray(jnp.reshape(xf, (2, -1))))

    print("KERNEL_OK")
</pallas_src>

<mosaic_0001>
module attributes {stable_mosaic.version = 11 : i64} {
  func.func @_copy_kernel(%arg0: i32, %arg1: memref<1x2048xf32, #tpu.memory_space<vmem>>, %arg2: memref<1x2048xf32, #tpu.memory_space<vmem>>) attributes {dimension_semantics = [#tpu.dimension_semantics<parallel>], iteration_bounds = array<i64: 1>, scalar_prefetch = 0 : i64, scratch_operands = 0 : i64, tpu.core_type = #tpu.core_type<tc>, window_params = [{transform_indices = @transform_0, window_bounds = array<i64: 1, 2048>}, {transform_indices = @transform_1, window_bounds = array<i64: 1, 2048>}]} {
    %c0 = arith.constant 0 : index
    %c0_0 = arith.constant 0 : index
    %0 = vector.load %arg1[%c0, %c0_0] : memref<1x2048xf32, #tpu.memory_space<vmem>>, vector<1x2048xf32>
    %c0_1 = arith.constant 0 : index
    %c0_2 = arith.constant 0 : index
    %1 = vector.load %arg2[%c0_1, %c0_2] : memref<1x2048xf32, #tpu.memory_space<vmem>>, vector<1x2048xf32>
    tpu.vector_store %arg2[%c0_1, %c0_2], %0 {strides = array<i32>} : memref<1x2048xf32, #tpu.memory_space<vmem>>, vector<1x2048xf32>,
    return
  }
  func.func @transform_0(%arg0: i32) -> (i32, i32) {
    %c0_i32 = arith.constant 0 : i32
    %c0_i32_0 = arith.constant 0 : i32
    return %arg0, %c0_i32 : i32, i32
  }
  func.func @transform_1(%arg0: i32) -> (i32, i32) {
    %c0_i32 = arith.constant 0 : i32
    %c0_i32_0 = arith.constant 0 : i32
    return %arg0, %c0_i32 : i32, i32
  }
}

</mosaic_0001>

<bundles_post_ra>
// kernel: tpu_custom_call.1
= control target key start
LH: loop header
LB: loop body
LE: loop exit
PB: predicated region body
PF: predicated region fallthrough
CT: control target
= control target key end

     0   :  { %6 = vsyncpa [#allocation3], 0  ;;  %s126_s0 = inlined_call_operand.hbm [shape: f32[1,2048], index: 0, kind: input, shape index: {}]   ;;  %s127_s1 = inlined_call_operand.hbm [shape: f32[1,2048], index: 1, kind: output, shape index: {}]  }
   0x1   :  { %7 = vsyncpa [#allocation4], 0  ;;  %s90_s6 = smov [#allocation2]   ;;  %s42_s10 = scalar_lea.hbm %s126_s0, 256 }
   0x2   :  { %s14_s7 = sshll.u32 %s90_s6, 4  ;;  %p43_p0 = scmp.ne.s32.totalorder %s126_s0, %s42_s10  ;;  %s15_s7 = int_to_ptr.vmem [resolvable:$true] %s14_s7 }
   0x3   :  { %p46_p1 = scmp.lt.u32.totalorder %s42_s10, %s126_s0 }
   0x5   :  { %p48_p2 = pnand %p46_p1, %p43_p0 }
   0x7   :  { %51 = shalt.err (!%p48_p2)
}
   0x8   :  { %s52_s15 = scalar_lea.vmem %s15_s7, 256  ;;  %p57_p4 = scmp.lt.s32.totalorder %s15_s7, %s15_s7 }
   0x9   :  { %p53_p3 = scmp.ne.s32.totalorder %s15_s7, %s52_s15  ;;  %p58_p5 = scmp.lt.s32.totalorder %s52_s15, %s52_s15 }
   0xb   :  { %p59_p6 = por %p58_p5, %p57_p4 }
   0xd   :  { %p60_p7 = pnand %p59_p6, %p53_p3 }
   0xf   :  { %63 = shalt.err (!%p60_p7)
}
  0x10   :  { %17 = dma.hbm_to_vmem [thread:$0]  %s126_s0, 256, %s15_s7, [#allocation3]  }
  0x11   :  { %86 = dma.done.wait [#allocation3], 256  }
  0x12   :  { %87 = vsyncadd [#allocation3], 4294967040  ;;  %s91_s18 = smov [#allocation5]   ;;  %v21_v0 = vld [vmem:[#allocation2] sm:$0xff]  ;;  %v22_v1 = vld [vmem:[#allocation2 + $0x8] sm:$0xff] }
  0x13   :  { %s31_s19 = sshll.u32 %s91_s18, 4  ;;  %23 = vst [vmem:[#allocation5] sm:$0xff] %v21_v0  ;;  %24 = vst [vmem:[#allocation5 + $0x8] sm:$0xff] %v22_v1  ;;  %s32_s19 = int_to_ptr.vmem [resolvable:$true] %s31_s19 }
  0x14   :  { %s64_s20 = scalar_lea.vmem %s32_s19, 256  ;;  %p69_p9 = scmp.lt.s32.totalorder %s32_s19, %s32_s19 }
  0x15   :  { %p65_p8 = scmp.ne.s32.totalorder %s32_s19, %s64_s20  ;;  %p70_p10 = scmp.lt.s32.totalorder %s64_s20, %s64_s20 }
  0x17   :  { %p71_p11 = por %p70_p10, %p69_p9 }
  0x19   :  { %p72_p12 = pnand %p71_p11, %p65_p8 }
  0x1b   :  { %75 = shalt.err (!%p72_p12)
}
  0x1c   :  { %s76_s0 = scalar_lea.hbm %s127_s1, 256 }
  0x1d   :  { %p77_p13 = scmp.ne.s32.totalorder %s127_s1, %s76_s0  ;;  %p80_p0 = scmp.lt.u32.totalorder %s76_s0, %s127_s1 }
  0x1f   :  { %p82_p1 = pnand %p80_p0, %p77_p13 }
  0x21   :  { %85 = shalt.err (!%p82_p1)
}
  0x22   :  { %34 = dma.vmem_to_hbm [thread:$0]  %s32_s19, 256, %s127_s1, [#allocation4]  }
  0x23   :  { %88 = dma.done.wait [#allocation4], 256  }
  0x24   :  { %89 = vsyncadd [#allocation4], 4294967040 }
  0x25   :  { %38 = vsyncpa [#allocation3], 1 }
  0x26   :  { %39 = vsyncpa [#allocation4], 1 }

</bundles_post_ra>
